<compile_context>
chip_gen: v6e
topology: v6e:2x2x1
jax: 0.10.0
libtpu: 0.0.40
codegen_flags: <defaults>
</compile_context>

<pallas_src>
import math
import functools

import jax
import jax.numpy as jnp
from jax.experimental import pallas as pl
from jax.experimental.pallas import tpu as pltpu

LEAKY_SLOPE = 0.2
# TODO(synk): LeakyReLU source not provided; assumed slope 0.2 with magnitude-preserving gain sqrt(2).
ACT_GAIN = math.sqrt(2.0)


# ----------------------- generation-aware sizing -----------------------

def _tpu_generation():
    try:
        kind = jax.devices()[0].device_kind.lower()
    except Exception:
        return "unknown"
    if "v5e" in kind or "v5 lite" in kind or "v5lite" in kind:
        return "v5e"
    if "v6" in kind:
        return "v6e"
    if "7" in kind:
        return "v7x"
    return "unknown"


def _vmem_capacity_bytes():
    try:
        return int(pltpu.get_tpu_info().vmem_capacity_bytes)
    except Exception:
        return None


_GEN = _tpu_generation()
_CAP = _vmem_capacity_bytes()

if _CAP is not None:
    if _GEN == "v5e":
        _VMEM_LIMIT = min(int(0.80 * _CAP), 112 * 1024 * 1024)   # big VMEM, low HBM BW
    else:
        _VMEM_LIMIT = min(int(0.55 * _CAP), 80 * 1024 * 1024)    # ~35 MiB on v7x's 64 MiB
else:
    _VMEM_LIMIT = {"v7x": 32, "v5e": 100}.get(_GEN, 64) * 1024 * 1024

if _GEN == "v5e":
    # v5e MXU is 4x128x128 -> 128-aligned N/K tiles; tm multiple of 8 is enough.
    _TM_PREFS = (1024, 512, 256, 128, 64, 32, 16, 8)
    _TN_PREFS = (512, 384, 256, 128)
    _TK_PREFS = (2048, 1024, 512, 256, 128)
elif _GEN == "v7x":
    # half the VMEM of v6e -> smaller caps on tiles.
    _TM_PREFS = (512, 256, 128, 64, 32, 16)
    _TN_PREFS = (512, 256)
    _TK_PREFS = (1024, 512, 256)
else:  # v6e / unknown
    _TM_PREFS = (1024, 512, 256, 128, 64, 32, 16)
    _TN_PREFS = (512, 256, 128)
    _TK_PREFS = (2048, 1024, 512, 256, 128)


def _cparams(*sem):
    return pltpu.CompilerParams(dimension_semantics=sem, vmem_limit_bytes=_VMEM_LIMIT)


def _pick(dim, prefs, *, want_multi_step=False):
    if want_multi_step:
        for t in prefs:
            if dim % t == 0 and dim // t >= 2:
                return t
    for t in prefs:
        if dim % t == 0:
            return t
    return dim


# ----------------------------- generic tiled matmul -----------------------------

def _leaky(acc):
    return jnp.where(acc >= 0.0, acc, acc * LEAKY_SLOPE) * ACT_GAIN


def _matmul_kernel_fused(x_ref, w_ref, o_ref, *, activate):
    # K fits in one block: straight MXU dot -> optional LeakyReLU -> store.  No scratch,
    # no reduction grid axis, no pl.when predication (feedback item).
    acc = jnp.dot(x_ref[...], w_ref[...], preferred_element_type=jnp.float32)
    if activate:
        acc = _leaky(acc)
    o_ref[...] = acc.astype(o_ref.dtype)


def _matmul_kernel_acc(x_ref, w_ref, o_ref, acc_ref, *, activate):
    # K tiled: f32 VMEM accumulator with pl.when init/finalize.
    @pl.when(pl.program_id(2) == 0)
    def _init():
        acc_ref[...] = jnp.zeros_like(acc_ref)

    acc_ref[...] += jnp.dot(x_ref[...], w_ref[...], preferred_element_type=jnp.float32)

    @pl.when(pl.program_id(2) == pl.num_programs(2) - 1)
    def _fin():
        acc = acc_ref[...]
        if activate:
            acc = _leaky(acc)
        o_ref[...] = acc.astype(o_ref.dtype)


def pallas_matmul(x, w, *, activate=False, out_dtype=None):
    """(M, K) @ (K, N) with optional fused LeakyReLU.  bf16 operands, f32 accumulation."""
    m, k = x.shape
    k2, n = w.shape
    assert k == k2
    out_dtype = out_dtype or x.dtype
    tm = _pick(m, _TM_PREFS, want_multi_step=True)
    tn = n if n <= 1024 else _pick(n, _TN_PREFS)
    tk = k if k <= 2048 else _pick(k, _TK_PREFS)

    if tk == k:   # common case here: no-scratch fast path
        return pl.pallas_call(
            functools.partial(_matmul_kernel_fused, activate=activate),
            out_shape=jax.ShapeDtypeStruct((m, n), out_dtype),
            grid=(m // tm, n // tn),
            in_specs=[pl.BlockSpec((tm, k), lambda i, j: (i, 0)),
                      pl.BlockSpec((k, tn), lambda i, j: (0, j))],
            out_specs=pl.BlockSpec((tm, tn), lambda i, j: (i, j)),
            compiler_params=_cparams("parallel", "parallel"),
        )(x, w)

    return pl.pallas_call(
        functools.partial(_matmul_kernel_acc, activate=activate),
        out_shape=jax.ShapeDtypeStruct((m, n), out_dtype),
        grid=(m // tm, n // tn, k // tk),
        in_specs=[pl.BlockSpec((tm, tk), lambda i, j, kk: (i, kk)),
                  pl.BlockSpec((tk, tn), lambda i, j, kk: (kk, j))],
        out_specs=pl.BlockSpec((tm, tn), lambda i, j, kk: (i, j)),
        scratch_shapes=[pltpu.VMEM((tm, tn), jnp.float32)],
        compiler_params=_cparams("parallel", "parallel", "arbitrary"),
    )(x, w)


# -------------------- fused Linear2 + GenerativeBasis outer product --------------------

def _head_kernel(h_ref, w_ref, basis_ref, o_ref):
    # h: (B, H) bf16, w: (H, tc) bf16, basis: (tc, S) f32, o: (B, tc, S) f32.
    v = jnp.dot(h_ref[...], w_ref[...], preferred_element_type=jnp.float32)   # (B, tc)
    basis = basis_ref[...].astype(jnp.float32)                                # (tc, S)
    o_ref[...] = (v[:, :, None] * basis[None, :, :]).astype(o_ref.dtype)


def pallas_linear_basis(h, w_hid_c, basis_cs, *, out_dtype=jnp.float32):
    """out[b, c, s] = (h @ w)[b, c] * basis[c, s]  (s = flattened 4x4 spatial).

    Fuses the second (un-activated) Linear with the GenerativeBasis per-channel scale;
    tiled over output channels so the grid has multiple parallel steps and the (B, C)
    intermediate never leaves VMEM.  (Output last dim = 16 spatial is required by NCHW
    semantics; the tensor is tiny so the masked stores are negligible.)
    """
    b, hid = h.shape
    hid2, c = w_hid_c.shape
    c2, s = basis_cs.shape
    assert hid == hid2 and c == c2
    tc = _pick(c, (512, 256, 128), want_multi_step=True)
    return pl.pallas_call(
        _head_kernel,
        out_shape=jax.ShapeDtypeStruct((b, c, s), out_dtype),
        grid=(c // tc,),
        in_specs=[pl.BlockSpec((b, hid), lambda i: (0, 0)),
                  pl.BlockSpec((hid, tc), lambda i: (0, i)),
                  pl.BlockSpec((tc, s), lambda i: (i, 0))],
        out_specs=pl.BlockSpec((b, tc, s), lambda i: (0, i, 0)),
        compiler_params=_cparams("parallel"),
    )(h, w_hid_c, basis_cs)


# --------------------------- parameters & forward ---------------------------

def normalize_centered(w, centered=True, eps=1e-8):
    # TODO(synk): `Linear(..., Centered=True)` normalization source not provided; assumed
    # per-output-row mean-centering followed by unit-L2 normalization (magnitude-preserving style).
    w = w.astype(jnp.float32)
    w2 = w.reshape(w.shape[0], -1)
    if centered:
        w2 = w2 - jnp.mean(w2, axis=1, keepdims=True)
    w2 = w2 / jnp.sqrt(jnp.sum(w2 * w2, axis=1, keepdims=True) + eps)
    return w2.reshape(w.shape)


def prepare_params(raw):
    """Hoisted weight preprocessing (feedback): run once per parameter update, not per call."""
    c = raw['basis'].shape[0]
    return {
        'w1_t': normalize_centered(raw['w1']).T.astype(jnp.bfloat16),    # (In, Hidden)
        'w2_t': normalize_centered(raw['w2']).T.astype(jnp.bfloat16),    # (Hidden, C)
        'basis': raw['basis'].reshape(c, -1).astype(jnp.float32),        # (C, 16)
    }


def generative_head_forward(prep, x):
    """GenerativeHead.forward(x) = Basis( MLP(x) )."""
    b = x.shape[0]
    c, s = prep['basis'].shape
    # TODO(synk): Linear layers assumed bias-free (R3GAN-style MSR-initialized / normalized linears).
    h = pallas_matmul(x.astype(jnp.bfloat16), prep['w1_t'],
                      activate=True, out_dtype=jnp.bfloat16)              # Linear1 + LeakyReLU
    # ActivateOutput=False -> no activation after Linear2.
    # TODO(synk): GenerativeBasis source not provided; assumed Basis[None] * v[:, :, None, None]
    # with a learned (C, 4, 4) basis parameter (per the modified single-argument constructor).
    y = pallas_linear_basis(h, prep['w2_t'], prep['basis'])               # (B, C, 16) f32
    side = int(round(math.sqrt(s)))
    return y.reshape(b, c, side, side)                                    # (B, C, 4, 4)


def reference_forward(raw, x):
    """Pure-JAX reference (f32) for correctness checking."""
    w1 = normalize_centered(raw['w1'])
    w2 = normalize_centered(raw['w2'])
    h = x.astype(jnp.float32) @ w1.T
    h = jnp.where(h >= 0.0, h, h * LEAKY_SLOPE) * ACT_GAIN
    v = h @ w2.T
    return raw['basis'][None] * v[:, :, None, None]


# ----------------------------------- demo -----------------------------------

if __name__ == "__main__":
    BATCH, IN_DIM, HIDDEN, CHANNELS = 4, 64, 128, 256

    key = jax.random.PRNGKey(0)
    k1, k2, k3, kx = jax.random.split(key, 4)
    raw = {
        'w1': jax.random.normal(k1, (HIDDEN, IN_DIM), jnp.float32),
        'w2': jax.random.normal(k2, (CHANNELS, HIDDEN), jnp.float32),
        'basis': jax.random.normal(k3, (CHANNELS, 4, 4), jnp.float32),
    }
    x = jax.random.normal(kx, (BATCH, IN_DIM), jnp.float32)

    prep = prepare_params(raw)                       # hoisted weight prep, done once
    fwd = jax.jit(generative_head_forward)
    out = jax.block_until_ready(fwd(prep, x))

    assert out.shape == (BATCH, CHANNELS, 4, 4) and out.dtype == jnp.float32
    assert bool(jnp.all(jnp.isfinite(out)))

    ref = reference_forward(raw, x)
    rel = float(jnp.max(jnp.abs(out - ref)) / jnp.maximum(1.0, jnp.max(jnp.abs(ref))))
    assert rel < 3e-2, f"mismatch vs pure-JAX reference: rel={rel}"

    print("KERNEL_OK")
</pallas_src>

<mosaic_0001>
module attributes {stable_mosaic.version = 11 : i64} {
  func.func @_head_kernel(%arg0: i32, %arg1: memref<4x128xbf16, #tpu.memory_space<vmem>>, %arg2: memref<128x128xbf16, #tpu.memory_space<vmem>>, %arg3: memref<128x16xf32, #tpu.memory_space<vmem>>, %arg4: memref<4x128x16xf32, #tpu.memory_space<vmem>>) attributes {dimension_semantics = [#tpu.dimension_semantics<parallel>], iteration_bounds = array<i64: 2>, scalar_prefetch = 0 : i64, scratch_operands = 0 : i64, tpu.core_type = #tpu.core_type<tc>, window_params = [{pipeline_mode = #tpu.pipeline_mode<synchronous>, transform_indices = @transform_0, window_bounds = array<i64: 4, 128>}, {transform_indices = @transform_1, window_bounds = array<i64: 128, 128>}, {transform_indices = @transform_2, window_bounds = array<i64: 128, 16>}, {transform_indices = @transform_3, window_bounds = array<i64: 4, 128, 16>}]} {
    %c0 = arith.constant 0 : index
    %c0_0 = arith.constant 0 : index
    %0 = vector.load %arg1[%c0, %c0_0] : memref<4x128xbf16, #tpu.memory_space<vmem>>, vector<4x128xbf16>
    %c0_1 = arith.constant 0 : index
    %c0_2 = arith.constant 0 : index
    %1 = vector.load %arg2[%c0_1, %c0_2] : memref<128x128xbf16, #tpu.memory_space<vmem>>, vector<128x128xbf16>
    %cst = arith.constant dense<0.000000e+00> : vector<4x128xf32>
    %2 = tpu.matmul %0, %1, %cst {dimension_numbers = #tpu.dot_dimension_numbers<[1], [0], [0], [1], [0, 0, 1, 1], [], []>} : vector<4x128xbf16>, vector<128x128xbf16>, vector<4x128xf32> -> vector<4x128xf32>
    %c0_3 = arith.constant 0 : index
    %c0_4 = arith.constant 0 : index
    %3 = vector.load %arg3[%c0_3, %c0_4] : memref<128x16xf32, #tpu.memory_space<vmem>>, vector<128x16xf32>
    %4 = vector.shape_cast %2 : vector<4x128xf32> to vector<4x128x1xf32>
    %5 = vector.shape_cast %3 : vector<128x16xf32> to vector<1x128x16xf32>
    %6 = vector.broadcast %4 : vector<4x128x1xf32> to vector<4x128x16xf32>
    %7 = vector.broadcast %5 : vector<1x128x16xf32> to vector<4x128x16xf32>
    %8 = arith.mulf %6, %7 : vector<4x128x16xf32>
    %c0_5 = arith.constant 0 : index
    %c0_6 = arith.constant 0 : index
    %c0_7 = arith.constant 0 : index
    %9 = vector.load %arg4[%c0_5, %c0_6, %c0_7] : memref<4x128x16xf32, #tpu.memory_space<vmem>>, vector<4x128x16xf32>
    tpu.vector_store %arg4[%c0_5, %c0_6, %c0_7], %8 {strides = array<i32>} : memref<4x128x16xf32, #tpu.memory_space<vmem>>, vector<4x128x16xf32>,
    return
  }
  func.func @transform_0(%arg0: i32) -> (i32, i32) {
    %c0_i32 = arith.constant 0 : i32
    %c0_i32_0 = arith.constant 0 : i32
    %c0_i32_1 = arith.constant 0 : i32
    return %c0_i32, %c0_i32_0 : i32, i32
  }
  func.func @transform_1(%arg0: i32) -> (i32, i32) {
    %c0_i32 = arith.constant 0 : i32
    %c0_i32_0 = arith.constant 0 : i32
    return %c0_i32, %arg0 : i32, i32
  }
  func.func @transform_2(%arg0: i32) -> (i32, i32) {
    %c0_i32 = arith.constant 0 : i32
    %c0_i32_0 = arith.constant 0 : i32
    return %arg0, %c0_i32 : i32, i32
  }
  func.func @transform_3(%arg0: i32) -> (i32, i32, i32) {
    %c0_i32 = arith.constant 0 : i32
    %c0_i32_0 = arith.constant 0 : i32
    %c0_i32_1 = arith.constant 0 : i32
    return %c0_i32, %arg0, %c0_i32_0 : i32, i32, i32
  }
}

module attributes {stable_mosaic.version = 11 : i64} {
  func.func @_matmul_kernel_fused(%arg0: i32, %arg1: i32, %arg2: memref<4x64xbf16, #tpu.memory_space<vmem>>, %arg3: memref<64x128xbf16, #tpu.memory_space<vmem>>, %arg4: memref<4x128xbf16, #tpu.memory_space<vmem>>) attributes {dimension_semantics = [#tpu.dimension_semantics<parallel>, #tpu.dimension_semantics<parallel>], iteration_bounds = array<i64: 1, 1>, scalar_prefetch = 0 : i64, scratch_operands = 0 : i64, tpu.core_type = #tpu.core_type<tc>, window_params = [{transform_indices = @transform_0, window_bounds = array<i64: 4, 64>}, {transform_indices = @transform_1, window_bounds = array<i64: 64, 128>}, {transform_indices = @transform_2, window_bounds = array<i64: 4, 128>}]} {
    %c0 = arith.constant 0 : index
    %c0_0 = arith.constant 0 : index
    %0 = vector.load %arg2[%c0, %c0_0] : memref<4x64xbf16, #tpu.memory_space<vmem>>, vector<4x64xbf16>
    %c0_1 = arith.constant 0 : index
    %c0_2 = arith.constant 0 : index
    %1 = vector.load %arg3[%c0_1, %c0_2] : memref<64x128xbf16, #tpu.memory_space<vmem>>, vector<64x128xbf16>
    %cst = arith.constant dense<0.000000e+00> : vector<4x128xf32>
    %2 = tpu.matmul %0, %1, %cst {dimension_numbers = #tpu.dot_dimension_numbers<[1], [0], [0], [1], [0, 0, 1, 1], [], []>} : vector<4x64xbf16>, vector<64x128xbf16>, vector<4x128xf32> -> vector<4x128xf32>
    %cst_3 = arith.constant 0.000000e+00 : f32
    %3 = vector.broadcast %cst_3 : f32 to vector<4x128xf32>
    %4 = arith.cmpf oge, %2, %3 : vector<4x128xf32>
    %cst_4 = arith.constant 2.000000e-01 : f32
    %5 = vector.broadcast %cst_4 : f32 to vector<4x128xf32>
    %6 = arith.mulf %2, %5 : vector<4x128xf32>
    %7 = arith.select %4, %2, %6 : vector<4x128xi1>, vector<4x128xf32>
    %cst_5 = arith.constant 1.41421354 : f32
    %8 = vector.broadcast %cst_5 : f32 to vector<4x128xf32>
    %9 = arith.mulf %7, %8 : vector<4x128xf32>
    %10 = arith.truncf %9 : vector<4x128xf32> to vector<4x128xbf16>
    %c0_6 = arith.constant 0 : index
    %c0_7 = arith.constant 0 : index
    %11 = vector.load %arg4[%c0_6, %c0_7] : memref<4x128xbf16, #tpu.memory_space<vmem>>, vector<4x128xbf16>
    tpu.vector_store %arg4[%c0_6, %c0_7], %10 {strides = array<i32>} : memref<4x128xbf16, #tpu.memory_space<vmem>>, vector<4x128xbf16>,
    return
  }
  func.func @transform_0(%arg0: i32, %arg1: i32) -> (i32, i32) {
    %c0_i32 = arith.constant 0 : i32
    %c0_i32_0 = arith.constant 0 : i32
    return %arg0, %c0_i32 : i32, i32
  }
  func.func @transform_1(%arg0: i32, %arg1: i32) -> (i32, i32) {
    %c0_i32 = arith.constant 0 : i32
    %c0_i32_0 = arith.constant 0 : i32
    return %c0_i32, %arg1 : i32, i32
  }
  func.func @transform_2(%arg0: i32, %arg1: i32) -> (i32, i32) {
    %c0_i32 = arith.constant 0 : i32
    return %arg0, %arg1 : i32, i32
  }
}

</mosaic_0001>

<bundles_post_ra>
// kernel: generative_head_forward.2
= control target key start
LH: loop header
LB: loop body
LE: loop exit
PB: predicated region body
PF: predicated region fallthrough
CT: control target
= control target key end

     0   :  { %7 = vsyncpa [#allocation3], 0  ;;  %s167_s9 = smov [#allocation2]   ;;  %s196_s0 = inlined_call_operand.vmem [shape: bf16[4,64], index: 0, kind: input, shape index: {}]   ;;  %s197_s1 = inlined_call_operand.hbm [shape: bf16[64,128], index: 1, kind: input, shape index: {}]   ;;  %s198_s2 = inlined_call_operand.vmem [shape: bf16[4,128], index: 2, kind: output, shape index: {}]  }
   0x1   :  { %s15_s10 = sshll.u32 %s167_s9, 4  ;;  %s16_s10 = int_to_ptr.vmem [resolvable:$true] %s15_s10 }
   0x2   :  { %s153_s11 = scalar_lea.vmem %s16_s10, 512  ;;  %p158_p1 = scmp.lt.s32.totalorder %s16_s10, %s16_s10 }
   0x3   :  { %p154_p0 = scmp.ne.s32.totalorder %s16_s10, %s153_s11  ;;  %p159_p2 = scmp.lt.s32.totalorder %s153_s11, %s153_s11 }
   0x5   :  { %p160_p3 = por %p159_p2, %p158_p1 }
   0x7   :  { %p161_p4 = pnand %p160_p3, %p154_p0 }
   0x9   :  { %164 = shalt.err (!%p161_p4)
}
   0xa   :  { %s168_s12 = smov 64   ;;  %s169_s13 = smov 4  }
   0xb   :  { %21 = dma.hbm_to_vmem [thread:$0]  %s197_s1, 512, %s16_s10, [#allocation3], %s168_s12, %s168_s12, %s169_s13  }
   0xc   :  { %165 = dma.done.wait [#allocation3], 512  }
   0xd   :  { %166 = vsyncadd [#allocation3], 4294966784  ;;  %v170_v0 = vmov 0.0   ;;  %vm171_vm0 = vmmov 0   ;;  %v141_v1 = vld [vmem:[#allocation2 + $0x18] sm:$0xff]   ;;  %v142_v2 = vld [vmem:[#allocation2 + $0x10] sm:$0xff]  }
   0xe   :  { %124 = vmatprep.subr.bf16.mxu0 %v170_v0  ;;  %132 = vmatprep.mubr.msk.bf16.mxu0 %vm171_vm0, %v170_v0  ;;  %v143_v3 = vld [vmem:[#allocation2 + $0x8] sm:$0xff]   ;;  %v144_v4 = vld [vmem:[#allocation2] sm:$0xff]   ;;  %vm59_vm1 = vcmask 523264  }
   0xf   :  { %125 = vmatpush3.bf16.msra.mxu0 %v141_v1  ;;  %v26_v5 = vld [vmem:[%s196_s0] sm:$0x3] }
  0x10   :  { %126 = vmatprep.subr.bf16.mxu0 %v170_v0 }
  0x13   :  { %127 = vmatpush3.bf16.msra.mxu0 %v142_v2 }
  0x14   :  { %128 = vmatprep.subr.bf16.mxu0 %v170_v0 }
  0x17   :  { %129 = vmatpush3.bf16.msra.mxu0 %v143_v3 }
  0x18   :  { %130 = vmatprep.subr.bf16.mxu0 %v170_v0 }
  0x1b   :  { %131 = vmatpush3.bf16.msra.mxu0 %v144_v4 }
  0x1e   :  { %133 = vmatmul.mubr.msk.bf16.vlgmr.msra.gmra.mxu0 %vm59_vm1, %v26_v5 }
  0xde   :  { %v97_v6 = vpop.f32.mrf.mxu0 }
  0xdf   :  { %vm103_vm2 = vcmp.ge.f32.partialorder %v97_v6, 0.0  ;;  %v104_v7 = vmul.f32 0.2, %v97_v6 }
  0xe0   :  { %v134_v8 = vpop.f32.mrf.mxu0 }
  0xe1   :  { %v105_v9 = vsel %vm103_vm2, %v97_v6, %v104_v7 }
  0xe2   :  { %v106_v10 = vmul.f32 1.4142135, %v105_v9  ;;  %v100_v11 = vpop.f32.mrf.mxu0 }
  0xe4   :  { %v107_v12 = vpack.c.bf16 %v106_v10, %v106_v10  ;;  %v135_v13 = vpop.f32.mrf.mxu0 }
  0xe6   :  { %108 = vst [vmem:[%s198_s2] sm:$0x3] %v107_v12 }
  0xe7   :  { %113 = vsyncpa [#allocation3], 1 }

// kernel: generative_head_forward.3
= control target key start
LH: loop header
LB: loop body
LE: loop exit
PB: predicated region body
PF: predicated region fallthrough
CT: control target
= control target key end

     0   :  { %s1307_s12 = smov 0   ;;  %s1309_s13 = smov 0   ;;  %s1788_s0 = inlined_call_operand.vmem [shape: bf16[4,128], index: 0, kind: input, shape index: {}]   ;;  %s1789_s1 = inlined_call_operand.vmem [shape: bf16[128,256], index: 1, kind: input, shape index: {}]   ;;  %s1790_s2 = inlined_call_operand.vmem [shape: f32[256,16], index: 2, kind: input, shape index: {}]   ;;  %s1791_s3 = inlined_call_operand.vmem [shape: f32[4,256,16], index: 3, kind: output, shape index: {}]  }
   0x1   :  { %s1311_s14 = smov 0  }
   0x2 LB: > { %s1323_s15 = sadd.s32 4294967295, %s1283_s14   ;;  %s1326_s16 = sadd.s32 1, %s1283_s14   ;;  %s1283_s14 = sphi %s1311_s14, %s1795_s14   ;;  %s1279_s13 = sphi %s1309_s13, %s1794_s13   ;;  %s1275_s12 = sphi %s1307_s12, %s1793_s12  }
   0x3   : > { %s38_s17 = ssub.s32 %s1283_s14, %s1326_s16  ;;  %s41_s18 = sadd.s32 1, %s1279_s13 }
   0x4   : > { %p39_p0 = scmp.eq.s32.totalorder %s38_s17, 0  ;;  %p48_p1 = scmp.ne.s32.totalorder %s1279_s13, %s1275_s12 }
   0x5   : > { %p49_p2 = scmp.eq.s32.totalorder %s1283_s14, 0  ;;  %p104_p3 = scmp.eq.s32.totalorder %s1323_s15, 1 }
   0x6   : > { %s1336_s19 = scalar_select %p39_p0, %s1279_s13, %s41_s18  }
   0x7   : > { %p50_p4 = por %p49_p2, %p48_p1  ;;  %p1338_p5 = por %p104_p3, %p48_p1 }
   0x8   : > { %p1176_p6 = scmp.ge.s32.totalorder %s1283_s14, 2 }
   0xa   : > { %129 = sbr.rel (%p1176_p6) target bundleno = 29 (0x1d), region = 20 }
   0xf   : > { %132 = sbr.rel (!%p50_p4) target bundleno = 29 (0x1d), region = 24  ;;  %s134_s21 = sand.u32 (%p50_p4), 1, %s1279_s13  }
  0x10   : > { %s1178_s22 = sshll.u32 (%p50_p4), %s1283_s14, 2  ;;  %s1177_s23 = sshll.u32 (%p50_p4), %s134_s21, 6 }
  0x11   : > { %s1348_s26 = scalar_lea.vmem (%p50_p4), %s1789_s1, %s1178_s22  ;;  %s136_s27 = scalar_lea.vmem (%p50_p4), [#allocation2], %s1177_s23 }
  0x12   : > { %v155_v0 = vld [vmem:[%s1348_s26] sm:$0xf] (%p50_p4)  ;;  %v157_v1 = vld [vmem:[%s1348_s26 + $0x8] sm:$0xf] (%p50_p4)  ;;  %v159_v2 = vld [vmem:[%s1348_s26 + $0x10] sm:$0xf] (%p50_p4) }
  0x13   : > { %156 = vst [vmem:[%s136_s27] sm:$0xf] (%p50_p4), %v155_v0  ;;  %158 = vst [vmem:[%s136_s27 + $0x4] sm:$0xf] (%p50_p4), %v157_v1  ;;  %v161_v3 = vld [vmem:[%s1348_s26 + $0x18] sm:$0xf] (%p50_p4) }
  0x14   : > { %v163_v4 = vld [vmem:[%s1348_s26 + $0x20] sm:$0xf]  ;;  %160 = vst [vmem:[%s136_s27 + $0x8] sm:$0xf] %v159_v2  ;;  %162 = vst [vmem:[%s136_s27 + $0xc] sm:$0xf] %v161_v3 }
  0x15   : > { %164 = vst [vmem:[%s136_s27 + $0x10] sm:$0xf] %v163_v4  ;;  %v165_v5 = vld [vmem:[%s1348_s26 + $0x28] sm:$0xf]  ;;  %v167_v6 = vld [vmem:[%s1348_s26 + $0x30] sm:$0xf] }
  0x16   : > { %v169_v7 = vld [vmem:[%s1348_s26 + $0x38] sm:$0xf]  ;;  %166 = vst [vmem:[%s136_s27 + $0x14] sm:$0xf] %v165_v5  ;;  %168 = vst [vmem:[%s136_s27 + $0x18] sm:$0xf] %v167_v6 }
  0x17   : > { %170 = vst [vmem:[%s136_s27 + $0x1c] sm:$0xf] %v169_v7  ;;  %v171_v8 = vld [vmem:[%s1348_s26 + $0x40] sm:$0xf]  ;;  %v173_v9 = vld [vmem:[%s1348_s26 + $0x48] sm:$0xf] }
  0x18   : > { %v175_v10 = vld [vmem:[%s1348_s26 + $0x50] sm:$0xf]  ;;  %172 = vst [vmem:[%s136_s27 + $0x20] sm:$0xf] %v171_v8  ;;  %174 = vst [vmem:[%s136_s27 + $0x24] sm:$0xf] %v173_v9 }
  0x19   : > { %176 = vst [vmem:[%s136_s27 + $0x28] sm:$0xf] %v175_v10  ;;  %v177_v11 = vld [vmem:[%s1348_s26 + $0x58] sm:$0xf]  ;;  %v179_v12 = vld [vmem:[%s1348_s26 + $0x60] sm:$0xf] }
  0x1a   : > { %v181_v13 = vld [vmem:[%s1348_s26 + $0x68] sm:$0xf]  ;;  %178 = vst [vmem:[%s136_s27 + $0x2c] sm:$0xf] %v177_v11  ;;  %180 = vst [vmem:[%s136_s27 + $0x30] sm:$0xf] %v179_v12 }
  0x1b   : > { %182 = vst [vmem:[%s136_s27 + $0x34] sm:$0xf] %v181_v13  ;;  %v183_v14 = vld [vmem:[%s1348_s26 + $0x70] sm:$0xf]  ;;  %v185_v15 = vld [vmem:[%s1348_s26 + $0x78] sm:$0xf] }
  0x1c   : > { %184 = vst [vmem:[%s136_s27 + $0x38] sm:$0xf] %v183_v14  ;;  %186 = vst [vmem:[%s136_s27 + $0x3c] sm:$0xf] %v185_v15 }
  0x1d PF: > { %p1179_p7 = scmp.ge.s32.totalorder %s1283_s14, 1  ;;  %p250_p8 = scmp.lt.s32.totalorder %s1283_s14, 3 }
  0x1f   : > { %p251_p9 = pnand %p1179_p7, %p250_p8 }
  0x20   : > { %s257_s28 = sand.u32 (!%p251_p9), 1, %s1275_s12   ;;  %s1182_s6 = sshll.u32 (!%p251_p9), %s1323_s15, 4 }
  0x21   : > { %254 = sbr.rel (%p251_p9) target bundleno = 516 (0x204), region = 69  ;;  %s1180_s29 = sshll.u32 (!%p251_p9), %s257_s28, 6 }
  0x22   : > { %s259_s30 = scalar_lea.vmem (!%p251_p9), [#allocation2], %s1180_s29  ;;  %p285_p10 = scmp.lt.s32.totalorder (!%p251_p9), %s1182_s6, 31 }
  0x23   : > { %s1181_s11 = sshll.u32 (!%p251_p9), %s257_s28, 9 }
  0x24   : > { %s1410_s12 = scalar_lea.vmem (!%p251_p9), [#allocation3], %s1181_s11 }
  0x26   : > { %v1285_v16 = vmov 0.0   ;;  %vm1286_vm0 = vmmov 0   ;;  %v1253_v17 = vld [vmem:[%s259_s30 + $0x38] sm:$0xff]   ;;  %v1254_v18 = vld [vmem:[%s259_s30 + $0x30] sm:$0xff]   ;;  %v1255_v19 = vld [vmem:[%s259_s30 + $0x28] sm:$0xff]   ;;  %v413_v26 = vlaneseq  ;;  %s1797_s6 = smov (!%p285_p10, %s1182_s6), 31 }
  0x27   : > { %1207 = vmatprep.subr.bf16.mxu0 %v1285_v16  ;;  %1223 = vmatprep.mubr.msk.bf16.mxu0 %vm1286_vm0, %v1285_v16  ;;  %v1256_v20 = vld [vmem:[%s259_s30 + $0x20] sm:$0xff]   ;;  %v1257_v21 = vld [vmem:[%s259_s30 + $0x18] sm:$0xff]   ;;  %v1258_v22 = vld [vmem:[%s259_s30 + $0x10] sm:$0xff]   ;;  %s1183_s7 = sshll.u32 %s1797_s6, 3  ;;  %vm745_vm1 = vcmask 130048   ;;  %s1197_s14 = sshll.u32 (%p1338_p5), %s1323_s15, 7 }
  0x28   : > { %1208 = vmatpush3.bf16.msra.mxu0 %v1253_v17  ;;  %v1259_v23 = vld [vmem:[%s259_s30 + $0x8] sm:$0xff]   ;;  %v1260_v24 = vld [vmem:[%s259_s30] sm:$0xff]   ;;  %v414_v27 = vshrl.u32 %v413_v26, 7  ;;  %s1388_s10 = scalar_lea.vmem %s1790_s2, %s1183_s7  ;;  %s1651_s21 = scalar_lea.vmem (%p1338_p5), %s1791_s3, %s1197_s14 }
  0x29   : > { %1209 = vmatprep.subr.bf16.mxu0 %v1285_v16  ;;  %v292_v25 = vld [vmem:[%s1788_s0] sm:$0x3]  ;;  %v1395_v40 = vld [vmem:[%s1388_s10 + $0x10] sm:$0xff]  ;;  %v1405_v46 = vld [vmem:[%s1388_s10 + $0x18] sm:$0xff] }
  0x2a   : > { %v415_v28 = vsub.s32 0, %v414_v27  ;;  %v549_v29 = vsub.s32 2, %v414_v27  ;;  %v616_v30 = vsub.s32 3, %v414_v27  ;;  %v482_v38 = vsub.s32 1, %v414_v27  ;;  %v1398_v41 = vld [vmem:[%s1388_s10] sm:$0xff]  ;;  %v1408_v47 = vld [vmem:[%s1388_s10 + $0x8] sm:$0xff] }
  0x2b   : > { %v1421_v52 = vld [vmem:[%s1388_s10 + $0x28] sm:$0xff]  ;;  %v1424_v53 = vld [vmem:[%s1388_s10 + $0x20] sm:$0xff]  ;;  %v1435_v58 = vld [vmem:[%s1388_s10 + $0x38] sm:$0xff] }
  0x2c   : > { %1210 = vmatpush3.bf16.msra.mxu0 %v1254_v18  ;;  %v1438_v59 = vld [vmem:[%s1388_s10 + $0x30] sm:$0xff]  ;;  %v1447_v0 = vld [vmem:[%s1388_s10 + $0x48] sm:$0xff]  ;;  %v1450_v1 = vld [vmem:[%s1388_s10 + $0x40] sm:$0xff] }
  0x2d   : > { %1211 = vmatprep.subr.bf16.mxu0 %v1285_v16  ;;  %v1459_v6 = vld [vmem:[%s1388_s10 + $0x58] sm:$0xff]  ;;  %v1462_v7 = vld [vmem:[%s1388_s10 + $0x50] sm:$0xff]  ;;  %v1471_v12 = vld [vmem:[%s1388_s10 + $0x68] sm:$0xff] }
  0x2e   : > { %v1474_v13 = vld [vmem:[%s1388_s10 + $0x60] sm:$0xff]  ;;  %v1483_v18 = vld [vmem:[%s1388_s10 + $0x78] sm:$0xff] }
  0x30   : > { %1212 = vmatpush3.bf16.msra.mxu0 %v1255_v19  ;;  %v1486_v19 = vld [vmem:[%s1388_s10 + $0x70] sm:$0xff] }
  0x31   : > { %1213 = vmatprep.subr.bf16.mxu0 %v1285_v16 }
  0x34   : > { %1214 = vmatpush3.bf16.msra.mxu0 %v1256_v20 }
  0x35   : > { %1215 = vmatprep.subr.bf16.mxu0 %v1285_v16 }
  0x38   : > { %1216 = vmatpush3.bf16.msra.mxu0 %v1257_v21 }
  0x39   : > { %1217 = vmatprep.subr.bf16.mxu0 %v1285_v16 }
  0x3c   : > { %1218 = vmatpush3.bf16.msra.mxu0 %v1258_v22 }
  0x3d   : > { %1219 = vmatprep.subr.bf16.mxu0 %v1285_v16 }
  0x40   : > { %1220 = vmatpush3.bf16.msra.mxu0 %v1259_v23 }
  0x41   : > { %1221 = vmatprep.subr.bf16.mxu0 %v1285_v16 }
  0x44   : > { %1222 = vmatpush3.bf16.msra.mxu0 %v1260_v24 }
  0x47   : > { %1224 = vmatmul.mubr.bf16.vlgmr.msra.gmra.mxu0 %v292_v25 }
 0x107   : > { %v391_v31 = vpop.f32.mrf.mxu0 }
 0x108   : > { %v416_v32 = vrot.slane %v391_v31, %v415_v28  ;;  %v550_v33 = vrot.slane %v391_v31, %v549_v29  ;;  %v1374_v34 = vrot.slane %v391_v31, %v616_v30  ;;  %v483_v39 = vrot.slane %v391_v31, %v482_v38 }
 0x109   : > { %v1225_v35 = vpop.f32.mrf.mxu0 }
 0x10a   : > { %426 = vbcast.lane.b32.xlu1 %v416_v32, 272  ;;  %418 = vbcast.lane.b32.xlu0 %v416_v32, 256 }
 0x10b   : > { %v394_v36 = vpop.f32.mrf.mxu0 }
 0x10d   : > { %v1226_v37 = vpop.f32.mrf.mxu0 }
 0x10e   : > { %430 = vbcast.lane.b32.xlu1 %v416_v32, 280  ;;  %422 = vbcast.lane.b32.xlu0 %v416_v32, 264 }
 0x112   : > { %438 = vbcast.lane.b32.xlu1 %v416_v32, 296  ;;  %434 = vbcast.lane.b32.xlu0 %v416_v32, 288 }
 0x116   : > { %446 = vbcast.lane.b32.xlu1 %v416_v32, 312  ;;  %442 = vbcast.lane.b32.xlu0 %v416_v32, 304 }
 0x11a   : > { %454 = vbcast.lane.b32.xlu1 %v416_v32, 328  ;;  %450 = vbcast.lane.b32.xlu0 %v416_v32, 320 }
 0x11e   : > { %462 = vbcast.lane.b32.xlu1 %v416_v32, 344  ;;  %458 = vbcast.lane.b32.xlu0 %v416_v32, 336 }
 0x122   : > { %470 = vbcast.lane.b32.xlu1 %v416_v32, 360  ;;  %466 = vbcast.lane.b32.xlu0 %v416_v32, 352 }
 0x126   : > { %478 = vbcast.lane.b32.xlu1 %v416_v32, 376  ;;  %474 = vbcast.lane.b32.xlu0 %v416_v32, 368 }
 0x12a   : > { %489 = vbcast.lane.b32.xlu1 %v483_v39, 264  ;;  %485 = vbcast.lane.b32.xlu0 %v483_v39, 256 }
 0x12e   : > { %497 = vbcast.lane.b32.xlu1 %v483_v39, 280  ;;  %493 = vbcast.lane.b32.xlu0 %v483_v39, 272 }
 0x132   : > { %505 = vbcast.lane.b32.xlu1 %v483_v39, 296  ;;  %501 = vbcast.lane.b32.xlu0 %v483_v39, 288 }
 0x136   : > { %513 = vbcast.lane.b32.xlu1 %v483_v39, 312  ;;  %509 = vbcast.lane.b32.xlu0 %v483_v39, 304 }
 0x13a   : > { %521 = vbcast.lane.b32.xlu1 %v483_v39, 328  ;;  %517 = vbcast.lane.b32.xlu0 %v483_v39, 320 }
 0x13e   : > { %529 = vbcast.lane.b32.xlu1 %v483_v39, 344  ;;  %525 = vbcast.lane.b32.xlu0 %v483_v39, 336 }
 0x142   : > { %537 = vbcast.lane.b32.xlu1 %v483_v39, 360  ;;  %533 = vbcast.lane.b32.xlu0 %v483_v39, 352 }
 0x146   : > { %545 = vbcast.lane.b32.xlu1 %v483_v39, 376  ;;  %541 = vbcast.lane.b32.xlu0 %v483_v39, 368 }
 0x14a   : > { %556 = vbcast.lane.b32.xlu1 %v550_v33, 264  ;;  %552 = vbcast.lane.b32.xlu0 %v550_v33, 256 }
 0x14e   : > { %564 = vbcast.lane.b32.xlu1 %v550_v33, 280  ;;  %560 = vbcast.lane.b32.xlu0 %v550_v33, 272 }
 0x152   : > { %572 = vbcast.lane.b32.xlu1 %v550_v33, 296  ;;  %568 = vbcast.lane.b32.xlu0 %v550_v33, 288 }
 0x156   : > { %580 = vbcast.lane.b32.xlu1 %v550_v33, 312  ;;  %576 = vbcast.lane.b32.xlu0 %v550_v33, 304 }
 0x15a   : > { %588 = vbcast.lane.b32.xlu1 %v550_v33, 328  ;;  %584 = vbcast.lane.b32.xlu0 %v550_v33, 320 }
 0x15e   : > { %596 = vbcast.lane.b32.xlu1 %v550_v33, 344  ;;  %592 = vbcast.lane.b32.xlu0 %v550_v33, 336 }
 0x162   : > { %604 = vbcast.lane.b32.xlu1 %v550_v33, 360  ;;  %600 = vbcast.lane.b32.xlu0 %v550_v33, 352 }
 0x166   : > { %612 = vbcast.lane.b32.xlu1 %v550_v33, 376  ;;  %608 = vbcast.lane.b32.xlu0 %v550_v33, 368 }
 0x16a   : > { %623 = vbcast.lane.b32.xlu1 %v1374_v34, 264  ;;  %619 = vbcast.lane.b32.xlu0 %v1374_v34, 256 }
 0x16e   : > { %631 = vbcast.lane.b32.xlu1 %v1374_v34, 280  ;;  %627 = vbcast.lane.b32.xlu0 %v1374_v34, 272 }
 0x172   : > { %639 = vbcast.lane.b32.xlu1 %v1374_v34, 296  ;;  %635 = vbcast.lane.b32.xlu0 %v1374_v34, 288 }
 0x176   : > { %647 = vbcast.lane.b32.xlu1 %v1374_v34, 312  ;;  %643 = vbcast.lane.b32.xlu0 %v1374_v34, 304 }
 0x17a   : > { %655 = vbcast.lane.b32.xlu1 %v1374_v34, 328  ;;  %651 = vbcast.lane.b32.xlu0 %v1374_v34, 320 }
 0x17c   : > { %v427_v42 = vpop.permute.xlu1 %426  ;;  %v419_v43 = vpop.permute.xlu0 %418 }
 0x17d   : > { %v683_v44 = vmul.f32 %v427_v42, %v1395_v40  ;;  %v681_v45 = vmul.f32 %v419_v43, %v1398_v41 }
 0x17e   : > { %663 = vbcast.lane.b32.xlu1 %v1374_v34, 344  ;;  %659 = vbcast.lane.b32.xlu0 %v1374_v34, 336 }
 0x17f   : > { %748 = vst.msk [vmem:[%s1410_s12 + $0x10] sm:$0xff] %vm745_vm1, %v683_v44  ;;  %746 = vst.msk [vmem:[%s1410_s12] sm:$0xff] %vm745_vm1, %v681_v45 }
 0x180   : > { %v431_v48 = vpop.permute.xlu1 %430  ;;  %v423_v49 = vpop.permute.xlu0 %422 }
 0x181   : > { %v684_v50 = vmul.f32 %v431_v48, %v1405_v46  ;;  %v682_v51 = vmul.f32 %v423_v49, %v1408_v47 }
 0x182   : > { %671 = vbcast.lane.b32.xlu1 %v1374_v34, 360  ;;  %667 = vbcast.lane.b32.xlu0 %v1374_v34, 352 }
 0x183   : > { %749 = vst.msk [vmem:[%s1410_s12 + $0x18] sm:$0xff] %vm745_vm1, %v684_v50  ;;  %747 = vst.msk [vmem:[%s1410_s12 + $0x8] sm:$0xff] %vm745_vm1, %v682_v51 }
 0x184   : > { %v439_v54 = vpop.permute.xlu1 %438  ;;  %v435_v55 = vpop.permute.xlu0 %434 }
 0x185   : > { %v686_v56 = vmul.f32 %v439_v54, %v1421_v52  ;;  %v685_v57 = vmul.f32 %v435_v55, %v1424_v53 }
 0x186   : > { %679 = vbcast.lane.b32.xlu1 %v1374_v34, 376  ;;  %675 = vbcast.lane.b32.xlu0 %v1374_v34, 368 }
 0x187   : > { %751 = vst.msk [vmem:[%s1410_s12 + $0x28] sm:$0xff] %vm745_vm1, %v686_v56  ;;  %750 = vst.msk [vmem:[%s1410_s12 + $0x20] sm:$0xff] %vm745_vm1, %v685_v57 }
 0x188   : > { %v447_v60 = vpop.permute.xlu1 %446  ;;  %v443_v61 = vpop.permute.xlu0 %442 }
 0x189   : > { %v688_v62 = vmul.f32 %v447_v60, %v1435_v58  ;;  %v687_v63 = vmul.f32 %v443_v61, %v1438_v59 }
 0x18b   : > { %753 = vst.msk [vmem:[%s1410_s12 + $0x38] sm:$0xff] %vm745_vm1, %v688_v62  ;;  %752 = vst.msk [vmem:[%s1410_s12 + $0x30] sm:$0xff] %vm745_vm1, %v687_v63 }
 0x18c   : > { %v455_v2 = vpop.permute.xlu1 %454  ;;  %v451_v3 = vpop.permute.xlu0 %450 }
 0x18d   : > { %v690_v4 = vmul.f32 %v455_v2, %v1447_v0  ;;  %v689_v5 = vmul.f32 %v451_v3, %v1450_v1 }
 0x18f   : > { %755 = vst.msk [vmem:[%s1410_s12 + $0x48] sm:$0xff] %vm745_vm1, %v690_v4  ;;  %754 = vst.msk [vmem:[%s1410_s12 + $0x40] sm:$0xff] %vm745_vm1, %v689_v5 }
 0x190   : > { %v463_v8 = vpop.permute.xlu1 %462  ;;  %v459_v9 = vpop.permute.xlu0 %458 }
 0x191   : > { %v692_v10 = vmul.f32 %v463_v8, %v1459_v6  ;;  %v691_v11 = vmul.f32 %v459_v9, %v1462_v7 }
 0x193   : > { %757 = vst.msk [vmem:[%s1410_s12 + $0x58] sm:$0xff] %vm745_vm1, %v692_v10  ;;  %756 = vst.msk [vmem:[%s1410_s12 + $0x50] sm:$0xff] %vm745_vm1, %v691_v11 }
 0x194   : > { %v471_v14 = vpop.permute.xlu1 %470  ;;  %v467_v15 = vpop.permute.xlu0 %466 }
 0x195   : > { %v694_v16 = vmul.f32 %v471_v14, %v1471_v12  ;;  %v693_v17 = vmul.f32 %v467_v15, %v1474_v13 }
 0x197   : > { %759 = vst.msk [vmem:[%s1410_s12 + $0x68] sm:$0xff] %vm745_vm1, %v694_v16  ;;  %758 = vst.msk [vmem:[%s1410_s12 + $0x60] sm:$0xff] %vm745_vm1, %v693_v17 }
 0x198   : > { %v479_v20 = vpop.permute.xlu1 %478  ;;  %v475_v21 = vpop.permute.xlu0 %474 }
 0x199   : > { %v696_v22 = vmul.f32 %v479_v20, %v1483_v18  ;;  %v695_v23 = vmul.f32 %v475_v21, %v1486_v19 }
 0x19b   : > { %761 = vst.msk [vmem:[%s1410_s12 + $0x78] sm:$0xff] %vm745_vm1, %v696_v22  ;;  %760 = vst.msk [vmem:[%s1410_s12 + $0x70] sm:$0xff] %vm745_vm1, %v695_v23 }
 0x19c   : > { %v490_v24 = vpop.permute.xlu1 %489  ;;  %v486_v25 = vpop.permute.xlu0 %485 }
 0x19d   : > { %v698_v26 = vmul.f32 %v490_v24, %v1408_v47  ;;  %v697_v27 = vmul.f32 %v486_v25, %v1398_v41 }
 0x19f   : > { %763 = vst.msk [vmem:[%s1410_s12 + $0x88] sm:$0xff] %vm745_vm1, %v698_v26  ;;  %762 = vst.msk [vmem:[%s1410_s12 + $0x80] sm:$0xff] %vm745_vm1, %v697_v27 }
 0x1a0   : > { %v498_v28 = vpop.permute.xlu1 %497  ;;  %v494_v29 = vpop.permute.xlu0 %493 }
 0x1a1   : > { %v700_v30 = vmul.f32 %v498_v28, %v1405_v46  ;;  %v699_v31 = vmul.f32 %v494_v29, %v1395_v40 }
 0x1a3   : > { %765 = vst.msk [vmem:[%s1410_s12 + $0x98] sm:$0xff] %vm745_vm1, %v700_v30  ;;  %764 = vst.msk [vmem:[%s1410_s12 + $0x90] sm:$0xff] %vm745_vm1, %v699_v31 }
 0x1a4   : > { %v506_v32 = vpop.permute.xlu1 %505  ;;  %v502_v33 = vpop.permute.xlu0 %501 }
 0x1a5   : > { %v702_v34 = vmul.f32 %v506_v32, %v1421_v52  ;;  %v701_v35 = vmul.f32 %v502_v33, %v1424_v53 }
 0x1a7   : > { %767 = vst.msk [vmem:[%s1410_s12 + $0xa8] sm:$0xff] %vm745_vm1, %v702_v34  ;;  %766 = vst.msk [vmem:[%s1410_s12 + $0xa0] sm:$0xff] %vm745_vm1, %v701_v35 }
 0x1a8   : > { %v514_v36 = vpop.permute.xlu1 %513  ;;  %v510_v37 = vpop.permute.xlu0 %509 }
 0x1a9   : > { %v704_v38 = vmul.f32 %v514_v36, %v1435_v58  ;;  %v703_v39 = vmul.f32 %v510_v37, %v1438_v59 }
 0x1ab   : > { %769 = vst.msk [vmem:[%s1410_s12 + $0xb8] sm:$0xff] %vm745_vm1, %v704_v38  ;;  %768 = vst.msk [vmem:[%s1410_s12 + $0xb0] sm:$0xff] %vm745_vm1, %v703_v39 }
 0x1ac   : > { %v522_v42 = vpop.permute.xlu1 %521  ;;  %v518_v43 = vpop.permute.xlu0 %517 }
 0x1ad   : > { %v706_v44 = vmul.f32 %v522_v42, %v1447_v0  ;;  %v705_v45 = vmul.f32 %v518_v43, %v1450_v1 }
 0x1af   : > { %771 = vst.msk [vmem:[%s1410_s12 + $0xc8] sm:$0xff] %vm745_vm1, %v706_v44  ;;  %770 = vst.msk [vmem:[%s1410_s12 + $0xc0] sm:$0xff] %vm745_vm1, %v705_v45 }
 0x1b0   : > { %v530_v48 = vpop.permute.xlu1 %529  ;;  %v526_v49 = vpop.permute.xlu0 %525 }
 0x1b1   : > { %v708_v50 = vmul.f32 %v530_v48, %v1459_v6  ;;  %v707_v51 = vmul.f32 %v526_v49, %v1462_v7 }
 0x1b3   : > { %773 = vst.msk [vmem:[%s1410_s12 + $0xd8] sm:$0xff] %vm745_vm1, %v708_v50  ;;  %772 = vst.msk [vmem:[%s1410_s12 + $0xd0] sm:$0xff] %vm745_vm1, %v707_v51 }
 0x1b4   : > { %v538_v54 = vpop.permute.xlu1 %537  ;;  %v534_v55 = vpop.permute.xlu0 %533 }
 0x1b5   : > { %v710_v56 = vmul.f32 %v538_v54, %v1471_v12  ;;  %v709_v57 = vmul.f32 %v534_v55, %v1474_v13 }
 0x1b7   : > { %775 = vst.msk [vmem:[%s1410_s12 + $0xe8] sm:$0xff] %vm745_vm1, %v710_v56  ;;  %774 = vst.msk [vmem:[%s1410_s12 + $0xe0] sm:$0xff] %vm745_vm1, %v709_v57 }
 0x1b8   : > { %v546_v60 = vpop.permute.xlu1 %545  ;;  %v542_v61 = vpop.permute.xlu0 %541 }
 0x1b9   : > { %v712_v62 = vmul.f32 %v546_v60, %v1483_v18  ;;  %v711_v63 = vmul.f32 %v542_v61, %v1486_v19 }
 0x1bb   : > { %777 = vst.msk [vmem:[%s1410_s12 + $0xf8] sm:$0xff] %vm745_vm1, %v712_v62  ;;  %776 = vst.msk [vmem:[%s1410_s12 + $0xf0] sm:$0xff] %vm745_vm1, %v711_v63 }
 0x1bc   : > { %v557_v2 = vpop.permute.xlu1 %556  ;;  %v553_v3 = vpop.permute.xlu0 %552 }
 0x1bd   : > { %v714_v4 = vmul.f32 %v557_v2, %v1408_v47  ;;  %v713_v5 = vmul.f32 %v553_v3, %v1398_v41 }
 0x1bf   : > { %779 = vst.msk [vmem:[%s1410_s12 + $0x108] sm:$0xff] %vm745_vm1, %v714_v4  ;;  %778 = vst.msk [vmem:[%s1410_s12 + $0x100] sm:$0xff] %vm745_vm1, %v713_v5 }
 0x1c0   : > { %v565_v8 = vpop.permute.xlu1 %564  ;;  %v561_v9 = vpop.permute.xlu0 %560 }
 0x1c1   : > { %v716_v10 = vmul.f32 %v565_v8, %v1405_v46  ;;  %v715_v11 = vmul.f32 %v561_v9, %v1395_v40  ;;  %v982_v8 = vld [vmem:[%s1410_s12 + $0x20] sm:$0xff] (%p1338_p5)  ;;  %v984_v9 = vld [vmem:[%s1410_s12 + $0x28] sm:$0xff] (%p1338_p5) }
 0x1c2   : > { %983 = vst [vmem:[%s1651_s21 + $0x20] sm:$0xff] (%p1338_p5), %v982_v8  ;;  %985 = vst [vmem:[%s1651_s21 + $0x28] sm:$0xff] (%p1338_p5), %v984_v9 }
 0x1c3   : > { %781 = vst.msk [vmem:[%s1410_s12 + $0x118] sm:$0xff] %vm745_vm1, %v716_v10  ;;  %780 = vst.msk [vmem:[%s1410_s12 + $0x110] sm:$0xff] %vm745_vm1, %v715_v11  ;;  %v986_v10 = vld [vmem:[%s1410_s12 + $0x30] sm:$0xff] (%p1338_p5)  ;;  %v988_v11 = vld [vmem:[%s1410_s12 + $0x38] sm:$0xff] (%p1338_p5) }
 0x1c4   : > { %v573_v14 = vpop.permute.xlu1 %572  ;;  %v569_v15 = vpop.permute.xlu0 %568  ;;  %987 = vst [vmem:[%s1651_s21 + $0x30] sm:$0xff] (%p1338_p5), %v986_v10  ;;  %989 = vst [vmem:[%s1651_s21 + $0x38] sm:$0xff] (%p1338_p5), %v988_v11 }
 0x1c5   : > { %v718_v16 = vmul.f32 %v573_v14, %v1421_v52  ;;  %v717_v17 = vmul.f32 %v569_v15, %v1424_v53  ;;  %v990_v14 = vld [vmem:[%s1410_s12 + $0x40] sm:$0xff] (%p1338_p5)  ;;  %v992_v15 = vld [vmem:[%s1410_s12 + $0x48] sm:$0xff] (%p1338_p5) }
 0x1c6   : > { %991 = vst [vmem:[%s1651_s21 + $0x40] sm:$0xff] (%p1338_p5), %v990_v14  ;;  %993 = vst [vmem:[%s1651_s21 + $0x48] sm:$0xff] (%p1338_p5), %v992_v15 }
 0x1c7   : > { %783 = vst.msk [vmem:[%s1410_s12 + $0x128] sm:$0xff] %vm745_vm1, %v718_v16  ;;  %782 = vst.msk [vmem:[%s1410_s12 + $0x120] sm:$0xff] %vm745_vm1, %v717_v17  ;;  %v994_v16 = vld [vmem:[%s1410_s12 + $0x50] sm:$0xff] (%p1338_p5)  ;;  %v996_v17 = vld [vmem:[%s1410_s12 + $0x58] sm:$0xff] (%p1338_p5) }
 0x1c8   : > { %v581_v20 = vpop.permute.xlu1 %580  ;;  %v577_v21 = vpop.permute.xlu0 %576  ;;  %995 = vst [vmem:[%s1651_s21 + $0x50] sm:$0xff] (%p1338_p5), %v994_v16  ;;  %997 = vst [vmem:[%s1651_s21 + $0x58] sm:$0xff] (%p1338_p5), %v996_v17 }
 0x1c9   : > { %v720_v22 = vmul.f32 %v581_v20, %v1435_v58  ;;  %v719_v23 = vmul.f32 %v577_v21, %v1438_v59  ;;  %v998_v20 = vld [vmem:[%s1410_s12 + $0x60] sm:$0xff] (%p1338_p5)  ;;  %v1000_v21 = vld [vmem:[%s1410_s12 + $0x68] sm:$0xff] (%p1338_p5) }
 0x1ca   : > { %999 = vst [vmem:[%s1651_s21 + $0x60] sm:$0xff] (%p1338_p5), %v998_v20  ;;  %1001 = vst [vmem:[%s1651_s21 + $0x68] sm:$0xff] (%p1338_p5), %v1000_v21 }
 0x1cb   : > { %785 = vst.msk [vmem:[%s1410_s12 + $0x138] sm:$0xff] %vm745_vm1, %v720_v22  ;;  %784 = vst.msk [vmem:[%s1410_s12 + $0x130] sm:$0xff] %vm745_vm1, %v719_v23  ;;  %v1002_v22 = vld [vmem:[%s1410_s12 + $0x70] sm:$0xff] (%p1338_p5)  ;;  %v1004_v23 = vld [vmem:[%s1410_s12 + $0x78] sm:$0xff] (%p1338_p5) }
 0x1cc   : > { %v589_v24 = vpop.permute.xlu1 %588  ;;  %v585_v25 = vpop.permute.xlu0 %584  ;;  %1003 = vst [vmem:[%s1651_s21 + $0x70] sm:$0xff] (%p1338_p5), %v1002_v22  ;;  %1005 = vst [vmem:[%s1651_s21 + $0x78] sm:$0xff] (%p1338_p5), %v1004_v23 }
 0x1cd   : > { %v722_v26 = vmul.f32 %v589_v24, %v1447_v0  ;;  %v721_v27 = vmul.f32 %v585_v25, %v1450_v1  ;;  %v1006_v24 = vld [vmem:[%s1410_s12 + $0x80] sm:$0xff] (%p1338_p5)  ;;  %v1008_v25 = vld [vmem:[%s1410_s12 + $0x88] sm:$0xff] (%p1338_p5) }
 0x1ce   : > { %1007 = vst [vmem:[%s1651_s21 + $0x100] sm:$0xff] (%p1338_p5), %v1006_v24  ;;  %1009 = vst [vmem:[%s1651_s21 + $0x108] sm:$0xff] (%p1338_p5), %v1008_v25 }
 0x1cf   : > { %787 = vst.msk [vmem:[%s1410_s12 + $0x148] sm:$0xff] %vm745_vm1, %v722_v26  ;;  %786 = vst.msk [vmem:[%s1410_s12 + $0x140] sm:$0xff] %vm745_vm1, %v721_v27  ;;  %v1010_v26 = vld [vmem:[%s1410_s12 + $0x90] sm:$0xff] (%p1338_p5)  ;;  %v1012_v27 = vld [vmem:[%s1410_s12 + $0x98] sm:$0xff] (%p1338_p5) }
 0x1d0   : > { %v597_v28 = vpop.permute.xlu1 %596  ;;  %v593_v29 = vpop.permute.xlu0 %592  ;;  %1011 = vst [vmem:[%s1651_s21 + $0x110] sm:$0xff] (%p1338_p5), %v1010_v26  ;;  %1013 = vst [vmem:[%s1651_s21 + $0x118] sm:$0xff] (%p1338_p5), %v1012_v27 }
 0x1d1   : > { %v724_v30 = vmul.f32 %v597_v28, %v1459_v6  ;;  %v723_v31 = vmul.f32 %v593_v29, %v1462_v7  ;;  %v1014_v28 = vld [vmem:[%s1410_s12 + $0xa0] sm:$0xff] (%p1338_p5)  ;;  %v1016_v29 = vld [vmem:[%s1410_s12 + $0xa8] sm:$0xff] (%p1338_p5) }
 0x1d2   : > { %1015 = vst [vmem:[%s1651_s21 + $0x120] sm:$0xff] (%p1338_p5), %v1014_v28  ;;  %1017 = vst [vmem:[%s1651_s21 + $0x128] sm:$0xff] (%p1338_p5), %v1016_v29 }
 0x1d3   : > { %789 = vst.msk [vmem:[%s1410_s12 + $0x158] sm:$0xff] %vm745_vm1, %v724_v30  ;;  %788 = vst.msk [vmem:[%s1410_s12 + $0x150] sm:$0xff] %vm745_vm1, %v723_v31  ;;  %v1018_v30 = vld [vmem:[%s1410_s12 + $0xb0] sm:$0xff] (%p1338_p5)  ;;  %v1020_v31 = vld [vmem:[%s1410_s12 + $0xb8] sm:$0xff] (%p1338_p5) }
 0x1d4   : > { %v605_v32 = vpop.permute.xlu1 %604  ;;  %v601_v33 = vpop.permute.xlu0 %600  ;;  %1019 = vst [vmem:[%s1651_s21 + $0x130] sm:$0xff] (%p1338_p5), %v1018_v30  ;;  %1021 = vst [vmem:[%s1651_s21 + $0x138] sm:$0xff] (%p1338_p5), %v1020_v31 }
 0x1d5   : > { %v726_v34 = vmul.f32 %v605_v32, %v1471_v12  ;;  %v725_v35 = vmul.f32 %v601_v33, %v1474_v13  ;;  %v1022_v32 = vld [vmem:[%s1410_s12 + $0xc0] sm:$0xff] (%p1338_p5)  ;;  %v1024_v33 = vld [vmem:[%s1410_s12 + $0xc8] sm:$0xff] (%p1338_p5) }
 0x1d6   : > { %1023 = vst [vmem:[%s1651_s21 + $0x140] sm:$0xff] (%p1338_p5), %v1022_v32  ;;  %1025 = vst [vmem:[%s1651_s21 + $0x148] sm:$0xff] (%p1338_p5), %v1024_v33 }
 0x1d7   : > { %791 = vst.msk [vmem:[%s1410_s12 + $0x168] sm:$0xff] %vm745_vm1, %v726_v34  ;;  %790 = vst.msk [vmem:[%s1410_s12 + $0x160] sm:$0xff] %vm745_vm1, %v725_v35  ;;  %v1026_v34 = vld [vmem:[%s1410_s12 + $0xd0] sm:$0xff] (%p1338_p5)  ;;  %v1028_v35 = vld [vmem:[%s1410_s12 + $0xd8] sm:$0xff] (%p1338_p5) }
 0x1d8   : > { %v613_v36 = vpop.permute.xlu1 %612  ;;  %v609_v37 = vpop.permute.xlu0 %608  ;;  %1027 = vst [vmem:[%s1651_s21 + $0x150] sm:$0xff] (%p1338_p5), %v1026_v34  ;;  %1029 = vst [vmem:[%s1651_s21 + $0x158] sm:$0xff] (%p1338_p5), %v1028_v35 }
 0x1d9   : > { %v728_v38 = vmul.f32 %v613_v36, %v1483_v18  ;;  %v727_v39 = vmul.f32 %v609_v37, %v1486_v19  ;;  %v1030_v36 = vld [vmem:[%s1410_s12 + $0xe0] sm:$0xff] (%p1338_p5)  ;;  %v1032_v37 = vld [vmem:[%s1410_s12 + $0xe8] sm:$0xff] (%p1338_p5) }
 0x1da   : > { %1031 = vst [vmem:[%s1651_s21 + $0x160] sm:$0xff] (%p1338_p5), %v1030_v36  ;;  %1033 = vst [vmem:[%s1651_s21 + $0x168] sm:$0xff] (%p1338_p5), %v1032_v37 }
 0x1db   : > { %793 = vst.msk [vmem:[%s1410_s12 + $0x178] sm:$0xff] %vm745_vm1, %v728_v38  ;;  %792 = vst.msk [vmem:[%s1410_s12 + $0x170] sm:$0xff] %vm745_vm1, %v727_v39  ;;  %v1034_v38 = vld [vmem:[%s1410_s12 + $0xf0] sm:$0xff] (%p1338_p5)  ;;  %v1036_v39 = vld [vmem:[%s1410_s12 + $0xf8] sm:$0xff] (%p1338_p5) }
 0x1dc   : > { %v624_v42 = vpop.permute.xlu1 %623  ;;  %v620_v43 = vpop.permute.xlu0 %619  ;;  %1035 = vst [vmem:[%s1651_s21 + $0x170] sm:$0xff] (%p1338_p5), %v1034_v38  ;;  %1037 = vst [vmem:[%s1651_s21 + $0x178] sm:$0xff] (%p1338_p5), %v1036_v39 }
 0x1dd   : > { %v730_v44 = vmul.f32 %v624_v42, %v1408_v47  ;;  %v729_v45 = vmul.f32 %v620_v43, %v1398_v41  ;;  %v1038_v42 = vld [vmem:[%s1410_s12 + $0x100] sm:$0xff] (%p1338_p5)  ;;  %v1040_v43 = vld [vmem:[%s1410_s12 + $0x108] sm:$0xff] (%p1338_p5) }
 0x1de   : > { %1039 = vst [vmem:[%s1651_s21 + $0x200] sm:$0xff] (%p1338_p5), %v1038_v42  ;;  %1041 = vst [vmem:[%s1651_s21 + $0x208] sm:$0xff] (%p1338_p5), %v1040_v43 }
 0x1df   : > { %795 = vst.msk [vmem:[%s1410_s12 + $0x188] sm:$0xff] %vm745_vm1, %v730_v44  ;;  %794 = vst.msk [vmem:[%s1410_s12 + $0x180] sm:$0xff] %vm745_vm1, %v729_v45  ;;  %v1042_v44 = vld [vmem:[%s1410_s12 + $0x110] sm:$0xff] (%p1338_p5)  ;;  %v1044_v45 = vld [vmem:[%s1410_s12 + $0x118] sm:$0xff] (%p1338_p5) }
 0x1e0   : > { %v632_v48 = vpop.permute.xlu1 %631  ;;  %v628_v49 = vpop.permute.xlu0 %627  ;;  %1043 = vst [vmem:[%s1651_s21 + $0x210] sm:$0xff] (%p1338_p5), %v1042_v44  ;;  %1045 = vst [vmem:[%s1651_s21 + $0x218] sm:$0xff] (%p1338_p5), %v1044_v45 }
 0x1e1   : > { %v732_v50 = vmul.f32 %v632_v48, %v1405_v46  ;;  %v731_v51 = vmul.f32 %v628_v49, %v1395_v40  ;;  %v1046_v48 = vld [vmem:[%s1410_s12 + $0x120] sm:$0xff] (%p1338_p5)  ;;  %v1048_v49 = vld [vmem:[%s1410_s12 + $0x128] sm:$0xff] (%p1338_p5) }
 0x1e2   : > { %1047 = vst [vmem:[%s1651_s21 + $0x220] sm:$0xff] (%p1338_p5), %v1046_v48  ;;  %1049 = vst [vmem:[%s1651_s21 + $0x228] sm:$0xff] (%p1338_p5), %v1048_v49 }
 0x1e3   : > { %797 = vst.msk [vmem:[%s1410_s12 + $0x198] sm:$0xff] %vm745_vm1, %v732_v50  ;;  %796 = vst.msk [vmem:[%s1410_s12 + $0x190] sm:$0xff] %vm745_vm1, %v731_v51  ;;  %v1050_v50 = vld [vmem:[%s1410_s12 + $0x130] sm:$0xff] (%p1338_p5)  ;;  %v1052_v51 = vld [vmem:[%s1410_s12 + $0x138] sm:$0xff] (%p1338_p5) }
 0x1e4   : > { %v640_v54 = vpop.permute.xlu1 %639  ;;  %v636_v47 = vpop.permute.xlu0 %635  ;;  %1051 = vst [vmem:[%s1651_s21 + $0x230] sm:$0xff] (%p1338_p5), %v1050_v50  ;;  %1053 = vst [vmem:[%s1651_s21 + $0x238] sm:$0xff] (%p1338_p5), %v1052_v51 }
 0x1e5   : > { %v734_v41 = vmul.f32 %v640_v54, %v1421_v52  ;;  %v733_v55 = vmul.f32 %v636_v47, %v1424_v53  ;;  %v1054_v54 = vld [vmem:[%s1410_s12 + $0x140] sm:$0xff] (%p1338_p5)  ;;  %v1056_v47 = vld [vmem:[%s1410_s12 + $0x148] sm:$0xff] (%p1338_p5) }
 0x1e6   : > { %1055 = vst [vmem:[%s1651_s21 + $0x240] sm:$0xff] (%p1338_p5), %v1054_v54  ;;  %1057 = vst [vmem:[%s1651_s21 + $0x248] sm:$0xff] (%p1338_p5), %v1056_v47 }
 0x1e7   : > { %799 = vst.msk [vmem:[%s1410_s12 + $0x1a8] sm:$0xff] %vm745_vm1, %v734_v41  ;;  %798 = vst.msk [vmem:[%s1410_s12 + $0x1a0] sm:$0xff] %vm745_vm1, %v733_v55  ;;  %v1058_v41 = vld [vmem:[%s1410_s12 + $0x150] sm:$0xff] (%p1338_p5)  ;;  %v1060_v55 = vld [vmem:[%s1410_s12 + $0x158] sm:$0xff] (%p1338_p5) }
 0x1e8   : > { %v648_v56 = vpop.permute.xlu1 %647  ;;  %v644_v46 = vpop.permute.xlu0 %643  ;;  %1059 = vst [vmem:[%s1651_s21 + $0x250] sm:$0xff] (%p1338_p5), %v1058_v41  ;;  %1061 = vst [vmem:[%s1651_s21 + $0x258] sm:$0xff] (%p1338_p5), %v1060_v55 }
 0x1e9   : > { %v736_v40 = vmul.f32 %v648_v56, %v1435_v58  ;;  %v735_v57 = vmul.f32 %v644_v46, %v1438_v59  ;;  %v1062_v56 = vld [vmem:[%s1410_s12 + $0x160] sm:$0xff] (%p1338_p5)  ;;  %v1064_v46 = vld [vmem:[%s1410_s12 + $0x168] sm:$0xff] (%p1338_p5) }
 0x1ea   : > { %1063 = vst [vmem:[%s1651_s21 + $0x260] sm:$0xff] (%p1338_p5), %v1062_v56  ;;  %1065 = vst [vmem:[%s1651_s21 + $0x268] sm:$0xff] (%p1338_p5), %v1064_v46 }
 0x1eb   : > { %801 = vst.msk [vmem:[%s1410_s12 + $0x1b8] sm:$0xff] %vm745_vm1, %v736_v40  ;;  %800 = vst.msk [vmem:[%s1410_s12 + $0x1b0] sm:$0xff] %vm745_vm1, %v735_v57  ;;  %v1066_v40 = vld [vmem:[%s1410_s12 + $0x170] sm:$0xff] (%p1338_p5)  ;;  %v1068_v57 = vld [vmem:[%s1410_s12 + $0x178] sm:$0xff] (%p1338_p5) }
 0x1ec   : > { %v656_v60 = vpop.permute.xlu1 %655  ;;  %v652_v52 = vpop.permute.xlu0 %651  ;;  %1067 = vst [vmem:[%s1651_s21 + $0x270] sm:$0xff] (%p1338_p5), %v1066_v40  ;;  %1069 = vst [vmem:[%s1651_s21 + $0x278] sm:$0xff] (%p1338_p5), %v1068_v57 }
 0x1ed   : > { %v738_v53 = vmul.f32 %v656_v60, %v1447_v0  ;;  %v737_v61 = vmul.f32 %v652_v52, %v1450_v1  ;;  %v1070_v60 = vld [vmem:[%s1410_s12 + $0x180] sm:$0xff] (%p1338_p5)  ;;  %v1072_v52 = vld [vmem:[%s1410_s12 + $0x188] sm:$0xff] (%p1338_p5) }
 0x1ee   : > { %1071 = vst [vmem:[%s1651_s21 + $0x300] sm:$0xff] (%p1338_p5), %v1070_v60  ;;  %1073 = vst [vmem:[%s1651_s21 + $0x308] sm:$0xff] (%p1338_p5), %v1072_v52 }
 0x1ef   : > { %803 = vst.msk [vmem:[%s1410_s12 + $0x1c8] sm:$0xff] %vm745_vm1, %v738_v53  ;;  %802 = vst.msk [vmem:[%s1410_s12 + $0x1c0] sm:$0xff] %vm745_vm1, %v737_v61  ;;  %v1074_v53 = vld [vmem:[%s1410_s12 + $0x190] sm:$0xff] (%p1338_p5)  ;;  %v1076_v61 = vld [vmem:[%s1410_s12 + $0x198] sm:$0xff] (%p1338_p5) }
 0x1f0   : > { %v664_v62 = vpop.permute.xlu1 %663  ;;  %v660_v58 = vpop.permute.xlu0 %659  ;;  %1075 = vst [vmem:[%s1651_s21 + $0x310] sm:$0xff] (%p1338_p5), %v1074_v53  ;;  %1077 = vst [vmem:[%s1651_s21 + $0x318] sm:$0xff] (%p1338_p5), %v1076_v61 }
 0x1f1   : > { %v740_v59 = vmul.f32 %v664_v62, %v1459_v6  ;;  %v739_v63 = vmul.f32 %v660_v58, %v1462_v7  ;;  %v1078_v62 = vld [vmem:[%s1410_s12 + $0x1a0] sm:$0xff] (%p1338_p5)  ;;  %v1080_v58 = vld [vmem:[%s1410_s12 + $0x1a8] sm:$0xff] (%p1338_p5) }
 0x1f2   : > { %1079 = vst [vmem:[%s1651_s21 + $0x320] sm:$0xff] (%p1338_p5), %v1078_v62  ;;  %1081 = vst [vmem:[%s1651_s21 + $0x328] sm:$0xff] (%p1338_p5), %v1080_v58 }
 0x1f3   : > { %805 = vst.msk [vmem:[%s1410_s12 + $0x1d8] sm:$0xff] %vm745_vm1, %v740_v59  ;;  %804 = vst.msk [vmem:[%s1410_s12 + $0x1d0] sm:$0xff] %vm745_vm1, %v739_v63  ;;  %v1082_v59 = vld [vmem:[%s1410_s12 + $0x1b0] sm:$0xff] (%p1338_p5)  ;;  %v1084_v63 = vld [vmem:[%s1410_s12 + $0x1b8] sm:$0xff] (%p1338_p5) }
 0x1f4   : > { %v672_v2 = vpop.permute.xlu1 %671  ;;  %v668_v0 = vpop.permute.xlu0 %667  ;;  %1083 = vst [vmem:[%s1651_s21 + $0x330] sm:$0xff] (%p1338_p5), %v1082_v59  ;;  %1085 = vst [vmem:[%s1651_s21 + $0x338] sm:$0xff] (%p1338_p5), %v1084_v63 }
 0x1f5   : > { %v742_v1 = vmul.f32 %v672_v2, %v1471_v12  ;;  %v741_v3 = vmul.f32 %v668_v0, %v1474_v13  ;;  %v974_v12 = vld [vmem:[%s1410_s12] sm:$0xff] (%p1338_p5)  ;;  %v976_v13 = vld [vmem:[%s1410_s12 + $0x8] sm:$0xff] (%p1338_p5) }
 0x1f6   : > { %975 = vst [vmem:[%s1651_s21] sm:$0xff] (%p1338_p5), %v974_v12  ;;  %977 = vst [vmem:[%s1651_s21 + $0x8] sm:$0xff] (%p1338_p5), %v976_v13  ;;  %v1086_v2 = vld [vmem:[%s1410_s12 + $0x1c0] sm:$0xff] (%p1338_p5)  ;;  %v1088_v0 = vld [vmem:[%s1410_s12 + $0x1c8] sm:$0xff] (%p1338_p5) }
 0x1f7   : > { %807 = vst.msk [vmem:[%s1410_s12 + $0x1e8] sm:$0xff] %vm745_vm1, %v742_v1  ;;  %806 = vst.msk [vmem:[%s1410_s12 + $0x1e0] sm:$0xff] %vm745_vm1, %v741_v3  ;;  %816 = sbr.rel (!%p1338_p5) target bundleno = 516 (0x204), region = 77 }
 0x1f8   : > { %v680_v4 = vpop.permute.xlu1 %679  ;;  %v676_v5 = vpop.permute.xlu0 %675  ;;  %1087 = vst [vmem:[%s1651_s21 + $0x340] sm:$0xff] (%p1338_p5), %v1086_v2  ;;  %1089 = vst [vmem:[%s1651_s21 + $0x348] sm:$0xff] (%p1338_p5), %v1088_v0 }
 0x1f9   : > { %v744_v6 = vmul.f32 %v680_v4, %v1483_v18  ;;  %v743_v7 = vmul.f32 %v676_v5, %v1486_v19  ;;  %v978_v18 = vld [vmem:[%s1410_s12 + $0x10] sm:$0xff] (%p1338_p5)  ;;  %v980_v19 = vld [vmem:[%s1410_s12 + $0x18] sm:$0xff] (%p1338_p5) }
 0x1fa   : > { %979 = vst [vmem:[%s1651_s21 + $0x10] sm:$0xff] (%p1338_p5), %v978_v18  ;;  %981 = vst [vmem:[%s1651_s21 + $0x18] sm:$0xff] (%p1338_p5), %v980_v19  ;;  %v1090_v1 = vld [vmem:[%s1410_s12 + $0x1d0] sm:$0xff] (%p1338_p5)  ;;  %v1092_v3 = vld [vmem:[%s1410_s12 + $0x1d8] sm:$0xff] (%p1338_p5) }
 0x1fb   : > { %809 = vst.msk [vmem:[%s1410_s12 + $0x1f8] sm:$0xff] %vm745_vm1, %v744_v6  ;;  %808 = vst.msk [vmem:[%s1410_s12 + $0x1f0] sm:$0xff] %vm745_vm1, %v743_v7 }
 0x1fc   : > { %1091 = vst [vmem:[%s1651_s21 + $0x350] sm:$0xff] %v1090_v1  ;;  %1093 = vst [vmem:[%s1651_s21 + $0x358] sm:$0xff] %v1092_v3 }
 0x1fe   : > { %v1094_v4 = vld [vmem:[%s1410_s12 + $0x1e0] sm:$0xff]  ;;  %v1096_v5 = vld [vmem:[%s1410_s12 + $0x1e8] sm:$0xff] }
 0x1ff   : > { %1095 = vst [vmem:[%s1651_s21 + $0x360] sm:$0xff] %v1094_v4  ;;  %1097 = vst [vmem:[%s1651_s21 + $0x368] sm:$0xff] %v1096_v5 }
 0x202   : > { %v1098_v6 = vld [vmem:[%s1410_s12 + $0x1f0] sm:$0xff]  ;;  %v1100_v7 = vld [vmem:[%s1410_s12 + $0x1f8] sm:$0xff] }
 0x203   : > { %1099 = vst [vmem:[%s1651_s21 + $0x370] sm:$0xff] %v1098_v6  ;;  %1101 = vst [vmem:[%s1651_s21 + $0x378] sm:$0xff] %v1100_v7 }
 0x204 PF: > { %p10_p11 = scmp.ge.s32.totalorder %s1326_s16, 4   ;;  %s1793_s12 = smov %s1279_s13 }
 0x205   : > { %s1794_s13 = smov %s1336_s19  ;;  %s1795_s14 = smov %s1326_s16 }
 0x206   :  { %12 = sbr.rel (!%p10_p11) target bundleno = 2 (0x2), region = 149 }

</bundles_post_ra>
